<compile_context>
chip_gen: v7x
topology: tpu7x:2x2x1
jax: 0.10.0
libtpu: 0.0.40
codegen_flags: <defaults>
</compile_context>

<pallas_src>
import functools

import numpy as np
import jax
import jax.numpy as jnp
from jax import lax
from jax.experimental import pallas as pl
from jax.experimental.pallas import tpu as pltpu


def _round_up(x, m):
    return ((x + m - 1) // m) * m


def detr_loss_kernel(logits_ref, tclass_ref, boxdelta_ref, out_ref, *,
                     num_classes, eos_coef, n_total, tile_n, chunks_per_core):
    """Accumulates raw sums [Σ|Δbox|, Σw·nll, Σw, Σcorrect] into out_ref[0,:4].

    Grid: (cores, chunks_per_core); the query-chunk axis is the reduction
    ("arbitrary") axis, the core axis is "parallel".
    """
    g = pl.program_id(0)
    i = pl.program_id(1)

    @pl.when(i == 0)
    def _init():
        out_ref[...] = jnp.zeros_like(out_ref)

    # ---- class loss over this chunk of queries -----------------------------
    lg = logits_ref[...].astype(jnp.float32)            # [TN, C1] native layout
    tc = tclass_ref[...]                                 # [TN, 1] int32
    TN, C1 = lg.shape

    # Rows past the real query count (ragged last tile / clamped extra tile)
    # are masked by a global-row-index check, so stale VMEM tails are ignored.
    chunk = g * chunks_per_core + i
    rows = chunk * tile_n + lax.broadcasted_iota(jnp.int32, (TN, 1), 0)
    valid = rows < n_total

    mx = jnp.max(lg, axis=1, keepdims=True)                               # [TN,1]
    lse = mx + jnp.log(jnp.sum(jnp.exp(lg - mx), axis=1, keepdims=True))  # [TN,1]

    cit = lax.broadcasted_iota(jnp.int32, (TN, C1), 1)   # class index per lane
    gathered = jnp.sum(jnp.where(cit == tc, lg, 0.0), axis=1, keepdims=True)
    nll = lse - gathered                                 # [TN,1]

    # empty_weight gather as a select: eos_coef for the no-object class.
    w_raw = jnp.where(tc == num_classes, eos_coef, 1.0)  # [TN,1] f32
    w = jnp.where(valid, w_raw, 0.0)
    wnll = jnp.where(valid, w_raw * nll, 0.0)

    # top-1 accuracy over matched queries (tc != num_classes with identity
    # matcher; real target classes never equal num_classes).
    pred = jnp.min(jnp.where(lg == mx, cit, C1), axis=1, keepdims=True)
    correct = jnp.where(valid & (tc != num_classes) & (pred == tc), 1.0, 0.0)

    s_wnll = jnp.sum(wnll)
    s_w = jnp.sum(w)
    s_cor = jnp.sum(correct)

    # ---- box L1 sum: lane-dense padded row, counted once (first step only) -
    is_first = (g == 0) & (i == 0)
    s_box = jnp.sum(jnp.abs(boxdelta_ref[...])) * jnp.where(is_first, 1.0, 0.0)

    # ---- accumulate raw sums into sublane 0, lanes 0..3 of the (8,128) slab -
    sub = lax.broadcasted_iota(jnp.int32, (8, 128), 0)
    lane = lax.broadcasted_iota(jnp.int32, (8, 128), 1)
    r0 = sub == 0
    partial = jnp.where(r0 & (lane == 0), s_box,
              jnp.where(r0 & (lane == 1), s_wnll,
              jnp.where(r0 & (lane == 2), s_w,
              jnp.where(r0 & (lane == 3), s_cor, 0.0))))
    out_ref[...] += partial


def detr_loss_forward(outputs, targets, sizes, num_classes, eos_coef, *,
                      tile_n=512):
    """Forward of detr_loss with losses = ['labels', 'boxes'].

    outputs: {'class': [B, Q, C+1] f32/bf16, 'box': [B, Q, 4] f32}
    targets: [sum(sizes), 5] f32 with columns [x, y, w, h, class]
    sizes:   python list of per-batch target counts
    """
    logits = outputs['class']
    boxes = outputs['box']
    B, Q, C1 = logits.shape
    N = B * Q

    # --- deterministic "matcher": query j of batch i <-> target row off_i+j --
    # TODO(synk): the Hungarian matcher (argmin over a cost matrix) is replaced
    # by this deterministic identity matching; it is an external dependency of
    # the module, not part of its forward compute.
    src_list, tgt_list, batch_list = [], [], []
    off = 0
    for i, s in enumerate(sizes):
        src_list.append(np.arange(s))
        tgt_list.append(off + np.arange(s))
        batch_list.append(np.full(s, i))
        off += s
    if sizes and sum(sizes) > 0:
        batch_idx = np.concatenate(batch_list).astype(np.int32)
        src_idx = np.concatenate(src_list).astype(np.int32)
        tgt_idx = np.concatenate(tgt_list).astype(np.int32)
    else:
        batch_idx = src_idx = tgt_idx = np.zeros(0, np.int32)
    M = int(len(src_idx))

    # --- glue: gathers / scatters (index plumbing, not hot compute) ---------
    # NOTE: real target class ids must be < num_classes; id == num_classes is
    # reserved for the "no object" class (weight eos_coef / unmatched mask).
    target_classes = jnp.full((B, Q), num_classes, dtype=jnp.int32)
    P = 128 if M == 0 else _round_up(4 * M, 128)
    boxdelta = jnp.zeros((1, P), jnp.float32)
    if M > 0:
        tb = targets[tgt_idx]                                   # [M, 5]
        target_classes_o = tb[:, 4].astype(jnp.int32)           # [M]
        target_classes = target_classes.at[batch_idx, src_idx].set(target_classes_o)
        delta = boxes[batch_idx, src_idx] - tb[:, :4]           # [M, 4]
        boxdelta = boxdelta.at[0, :4 * M].set(delta.reshape(-1).astype(jnp.float32))

    logits2d = logits.reshape(N, C1)          # native layout, no transpose
    tc2d = target_classes.reshape(N, 1)

    # --- tiling over the query axis + 2-core split --------------------------
    TN = max(8, min(_round_up(tile_n, 8), _round_up(N, 8)))
    chunks = -(-N // TN)
    G = 2 if chunks >= 2 else 1               # v7x: one slab per TensorCore
    cpc = -(-chunks // G)
    need_clamp = G * cpc > chunks

    def row_map(g, i):
        c = g * cpc + i
        if need_clamp:                         # extra steps re-read last valid
            c = jnp.minimum(c, chunks - 1)     # block; rows are masked in-kernel
        return (c, 0)

    kernel = functools.partial(
        detr_loss_kernel,
        num_classes=num_classes, eos_coef=float(eos_coef),
        n_total=N, tile_n=TN, chunks_per_core=cpc)

    raw = pl.pallas_call(
        kernel,
        grid=(G, cpc),
        in_specs=[
            pl.BlockSpec((TN, C1), row_map),
            pl.BlockSpec((TN, 1), row_map),
            pl.BlockSpec((1, P), lambda g, i: (0, 0)),
        ],
        out_specs=pl.BlockSpec((8, 128), lambda g, i: (g, 0)),
        out_shape=jax.ShapeDtypeStruct((8 * G, 128), jnp.float32),
        compiler_params=pltpu.CompilerParams(
            dimension_semantics=("parallel", "arbitrary")),
    )(logits2d, tc2d, boxdelta)

    # --- trivial scalar finalisation (keeps batch-dependent scalars out of
    #     the kernel, so varying `sizes` does not recompile the pallas_call) --
    s = jnp.sum(raw, axis=0)                   # (128,) raw sums
    num_boxes = max(float(sum(sizes)), 1.0)
    loss_bbox = s[0] / num_boxes
    loss_ce = s[1] / s[2]
    class_error = 100.0 - s[3] * (100.0 / float(max(M, 1)))
    return {'loss_ce': loss_ce, 'class_error': class_error,
            'loss_bbox': loss_bbox}


def detr_loss_reference(outputs, targets, sizes, num_classes, eos_coef):
    """Pure-JAX reference mirroring the PyTorch module (for verification)."""
    logits = outputs['class']
    boxes = outputs['box']
    B, Q, C1 = logits.shape

    batch_idx, src_idx, tgt_idx = [], [], []
    off = 0
    for i, s in enumerate(sizes):
        batch_idx += [i] * s
        src_idx += list(range(s))
        tgt_idx += list(range(off, off + s))
        off += s
    batch_idx = np.array(batch_idx); src_idx = np.array(src_idx)
    tgt_idx = np.array(tgt_idx)

    src_boxes = boxes[batch_idx, src_idx]
    tb = targets[tgt_idx]
    target_boxes = tb[:, :4]
    num_boxes = max(float(sum(sizes)), 1.0)
    loss_bbox = jnp.abs(src_boxes - target_boxes).sum() / num_boxes

    tco = tb[:, 4].astype(jnp.int32)
    target_classes = jnp.full((B, Q), num_classes, jnp.int32)
    target_classes = target_classes.at[batch_idx, src_idx].set(tco)
    empty_weight = jnp.ones((C1,), jnp.float32).at[-1].set(eos_coef)
    logp = jax.nn.log_softmax(logits, axis=-1)
    nll = -jnp.take_along_axis(logp, target_classes[..., None], axis=-1)[..., 0]
    w = empty_weight[target_classes]
    loss_ce = (w * nll).sum() / w.sum()

    ml = logits[batch_idx, src_idx]
    pred = jnp.argmax(ml, axis=-1)
    acc = (pred == tco).astype(jnp.float32).mean() * 100.0
    return {'loss_ce': loss_ce, 'class_error': 100.0 - acc,
            'loss_bbox': loss_bbox}


if __name__ == "__main__":
    num_classes = 4     # -> C+1 = 5 logits per query
    eos_coef = 0.1
    B, Q, DB = 2, 16, 4
    sizes = [3, 2]      # targets per batch element
    NT = sum(sizes)

    key = jax.random.PRNGKey(0)
    k1, k2, k3, k4 = jax.random.split(key, 4)
    outputs = {
        'class': jax.random.normal(k1, (B, Q, num_classes + 1), jnp.float32),
        'box': jax.random.uniform(k2, (B, Q, DB), jnp.float32),
    }
    tgt_boxes = jax.random.uniform(k3, (NT, 4), jnp.float32)
    tgt_cls = jax.random.randint(k4, (NT, 1), 0, num_classes).astype(jnp.float32)
    targets = jnp.concatenate([tgt_boxes, tgt_cls], axis=1)   # [NT, 5]

    # tile_n=8 -> 4 query chunks -> grid (2 cores, 2 chunks/core): exercises the
    # parallel core split, the pl.when init and the resident-accumulator path.
    losses = detr_loss_forward(outputs, targets, sizes, num_classes, eos_coef,
                               tile_n=8)
    losses = jax.tree_util.tree_map(jax.block_until_ready, losses)

    ref = detr_loss_reference(outputs, targets, sizes, num_classes, eos_coef)
    for k in ('loss_ce', 'loss_bbox', 'class_error'):
        np.testing.assert_allclose(np.asarray(losses[k]), np.asarray(ref[k]),
                                   rtol=1e-4, atol=1e-4)

    print("KERNEL_OK")
</pallas_src>

<mosaic_0001>
module attributes {stable_mosaic.version = 11 : i64} {
  func.func @detr_loss_kernel(%arg0: i32, %arg1: i32, %arg2: memref<8x5xf32, #tpu.memory_space<vmem>>, %arg3: memref<8x1xi32, #tpu.memory_space<vmem>>, %arg4: memref<1x128xf32, #tpu.memory_space<vmem>>, %arg5: memref<8x128xf32, #tpu.memory_space<vmem>>) attributes {dimension_semantics = [#tpu.dimension_semantics<parallel>, #tpu.dimension_semantics<arbitrary>], iteration_bounds = array<i64: 2, 2>, scalar_prefetch = 0 : i64, scratch_operands = 0 : i64, tpu.core_type = #tpu.core_type<tc>, window_params = [{transform_indices = @transform_0, window_bounds = array<i64: 8, 5>}, {transform_indices = @transform_1, window_bounds = array<i64: 8, 1>}, {pipeline_mode = #tpu.pipeline_mode<synchronous>, transform_indices = @transform_2, window_bounds = array<i64: 1, 128>}, {transform_indices = @transform_3, window_bounds = array<i64: 8, 128>}]} {
    %c0_i32 = arith.constant 0 : i32
    %0 = arith.cmpi eq, %arg1, %c0_i32 : i32
    %1 = arith.extui %0 : i1 to i32
    %c0_i32_0 = arith.constant 0 : i32
    %2 = arith.cmpi ne, %1, %c0_i32_0 : i32
    scf.if %2 {
      %cst_33 = arith.constant 0.000000e+00 : f32
      %105 = vector.broadcast %cst_33 : f32 to vector<8x128xf32>
      %c0_34 = arith.constant 0 : index
      %c0_35 = arith.constant 0 : index
      %106 = vector.load %arg5[%c0_34, %c0_35] : memref<8x128xf32, #tpu.memory_space<vmem>>, vector<8x128xf32>
      tpu.vector_store %arg5[%c0_34, %c0_35], %105 {strides = array<i32>} : memref<8x128xf32, #tpu.memory_space<vmem>>, vector<8x128xf32>,
    } else {
    }
    %c0 = arith.constant 0 : index
    %c0_1 = arith.constant 0 : index
    %3 = vector.load %arg2[%c0, %c0_1] : memref<8x5xf32, #tpu.memory_space<vmem>>, vector<8x5xf32>
    %c0_2 = arith.constant 0 : index
    %c0_3 = arith.constant 0 : index
    %4 = vector.load %arg3[%c0_2, %c0_3] : memref<8x1xi32, #tpu.memory_space<vmem>>, vector<8x1xi32>
    %c2_i32 = arith.constant 2 : i32
    %5 = arith.muli %arg0, %c2_i32 : i32
    %6 = arith.addi %5, %arg1 : i32
    %c8_i32 = arith.constant 8 : i32
    %7 = arith.muli %6, %c8_i32 : i32
    %8 = tpu.iota {dimensions = array<i32: 0>} : vector<8x1xi32>
    %9 = vector.broadcast %7 : i32 to vector<8x1xi32>
    %10 = arith.addi %9, %8 : vector<8x1xi32>
    %c32_i32 = arith.constant 32 : i32
    %11 = vector.broadcast %c32_i32 : i32 to vector<8x1xi32>
    %12 = arith.cmpi slt, %10, %11 : vector<8x1xi32>
    %cst = arith.constant dense<0xFF800000> : vector<8xf32>
    %13 = vector.multi_reduction <maximumf>, %3, %cst [1] : vector<8x5xf32> to vector<8xf32>
    %14 = vector.shape_cast %13 : vector<8xf32> to vector<8x1xf32>
    %15 = vector.broadcast %14 : vector<8x1xf32> to vector<8x5xf32>
    %16 = arith.subf %3, %15 : vector<8x5xf32>
    %17 = math.exp %16 : vector<8x5xf32>
    %cst_4 = arith.constant dense<0.000000e+00> : vector<8xf32>
    %18 = vector.multi_reduction <add>, %17, %cst_4 [1] : vector<8x5xf32> to vector<8xf32>
    %19 = vector.shape_cast %18 : vector<8xf32> to vector<8x1xf32>
    %20 = math.log %19 : vector<8x1xf32>
    %21 = arith.addf %14, %20 : vector<8x1xf32>
    %22 = tpu.iota {dimensions = array<i32: 1>} : vector<8x5xi32>
    %23 = vector.broadcast %4 : vector<8x1xi32> to vector<8x5xi32>
    %24 = arith.cmpi eq, %22, %23 : vector<8x5xi32>
    %cst_5 = arith.constant 0.000000e+00 : f32
    %25 = vector.broadcast %cst_5 : f32 to vector<8x5xf32>
    %26 = arith.select %24, %3, %25 : vector<8x5xi1>, vector<8x5xf32>
    %cst_6 = arith.constant dense<0.000000e+00> : vector<8xf32>
    %27 = vector.multi_reduction <add>, %26, %cst_6 [1] : vector<8x5xf32> to vector<8xf32>
    %28 = vector.shape_cast %27 : vector<8xf32> to vector<8x1xf32>
    %29 = arith.subf %21, %28 : vector<8x1xf32>
    %c4_i32 = arith.constant 4 : i32
    %30 = vector.broadcast %c4_i32 : i32 to vector<8x1xi32>
    %31 = arith.cmpi eq, %4, %30 : vector<8x1xi32>
    %cst_7 = arith.constant 1.000000e-01 : f32
    %cst_8 = arith.constant 1.000000e+00 : f32
    %32 = vector.broadcast %cst_7 : f32 to vector<8x1xf32>
    %33 = vector.broadcast %cst_8 : f32 to vector<8x1xf32>
    %34 = arith.select %31, %32, %33 : vector<8x1xi1>, vector<8x1xf32>
    %cst_9 = arith.constant 0.000000e+00 : f32
    %35 = vector.broadcast %cst_9 : f32 to vector<8x1xf32>
    %36 = arith.select %12, %34, %35 : vector<8x1xi1>, vector<8x1xf32>
    %37 = arith.mulf %34, %29 : vector<8x1xf32>
    %cst_10 = arith.constant 0.000000e+00 : f32
    %38 = vector.broadcast %cst_10 : f32 to vector<8x1xf32>
    %39 = arith.select %12, %37, %38 : vector<8x1xi1>, vector<8x1xf32>
    %40 = vector.broadcast %14 : vector<8x1xf32> to vector<8x5xf32>
    %41 = arith.cmpf oeq, %3, %40 : vector<8x5xf32>
    %c5_i32 = arith.constant 5 : i32
    %42 = vector.broadcast %c5_i32 : i32 to vector<8x5xi32>
    %43 = arith.select %41, %22, %42 : vector<8x5xi1>, vector<8x5xi32>
    %cst_11 = arith.constant dense<2147483647> : vector<8xi32>
    %44 = vector.multi_reduction <minsi>, %43, %cst_11 [1] : vector<8x5xi32> to vector<8xi32>
    %45 = vector.shape_cast %44 : vector<8xi32> to vector<8x1xi32>
    %c4_i32_12 = arith.constant 4 : i32
    %46 = vector.broadcast %c4_i32_12 : i32 to vector<8x1xi32>
    %47 = arith.cmpi ne, %4, %46 : vector<8x1xi32>
    %48 = arith.andi %12, %47 : vector<8x1xi1>
    %49 = arith.cmpi eq, %45, %4 : vector<8x1xi32>
    %50 = arith.andi %48, %49 : vector<8x1xi1>
    %cst_13 = arith.constant 1.000000e+00 : f32
    %cst_14 = arith.constant 0.000000e+00 : f32
    %51 = vector.broadcast %cst_13 : f32 to vector<8x1xf32>
    %52 = vector.broadcast %cst_14 : f32 to vector<8x1xf32>
    %53 = arith.select %50, %51, %52 : vector<8x1xi1>, vector<8x1xf32>
    %54 = vector.shape_cast %39 : vector<8x1xf32> to vector<1x8x1xf32>
    %cst_15 = arith.constant dense<0.000000e+00> : vector<1xf32>
    %55 = vector.multi_reduction <add>, %54, %cst_15 [1, 2] : vector<1x8x1xf32> to vector<1xf32>
    %56 = vector.shape_cast %55 : vector<1xf32> to vector<1x1x1xf32>
    %57 = vector.extract %56[0, 0, 0] : f32 from vector<1x1x1xf32>
    %58 = vector.shape_cast %36 : vector<8x1xf32> to vector<1x8x1xf32>
    %cst_16 = arith.constant dense<0.000000e+00> : vector<1xf32>
    %59 = vector.multi_reduction <add>, %58, %cst_16 [1, 2] : vector<1x8x1xf32> to vector<1xf32>
    %60 = vector.shape_cast %59 : vector<1xf32> to vector<1x1x1xf32>
    %61 = vector.extract %60[0, 0, 0] : f32 from vector<1x1x1xf32>
    %62 = vector.shape_cast %53 : vector<8x1xf32> to vector<1x8x1xf32>
    %cst_17 = arith.constant dense<0.000000e+00> : vector<1xf32>
    %63 = vector.multi_reduction <add>, %62, %cst_17 [1, 2] : vector<1x8x1xf32> to vector<1xf32>
    %64 = vector.shape_cast %63 : vector<1xf32> to vector<1x1x1xf32>
    %65 = vector.extract %64[0, 0, 0] : f32 from vector<1x1x1xf32>
    %c0_i32_18 = arith.constant 0 : i32
    %66 = arith.cmpi eq, %arg0, %c0_i32_18 : i32
    %c0_i32_19 = arith.constant 0 : i32
    %67 = arith.cmpi eq, %arg1, %c0_i32_19 : i32
    %68 = arith.andi %66, %67 : i1
    %c0_20 = arith.constant 0 : index
    %c0_21 = arith.constant 0 : index
    %69 = vector.load %arg4[%c0_20, %c0_21] : memref<1x128xf32, #tpu.memory_space<vmem>>, vector<1x128xf32>
    %70 = math.absf %69 : vector<1x128xf32>
    %71 = vector.shape_cast %70 : vector<1x128xf32> to vector<1x1x128xf32>
    %cst_22 = arith.constant dense<0.000000e+00> : vector<1xf32>
    %72 = vector.multi_reduction <add>, %71, %cst_22 [1, 2] : vector<1x1x128xf32> to vector<1xf32>
    %73 = vector.shape_cast %72 : vector<1xf32> to vector<1x1x1xf32>
    %74 = vector.extract %73[0, 0, 0] : f32 from vector<1x1x1xf32>
    %cst_23 = arith.constant 1.000000e+00 : f32
    %cst_24 = arith.constant 0.000000e+00 : f32
    %75 = arith.select %68, %cst_23, %cst_24 : f32
    %76 = arith.mulf %74, %75 : f32
    %77 = tpu.iota {dimensions = array<i32: 0>} : vector<8x128xi32>
    %78 = tpu.iota {dimensions = array<i32: 1>} : vector<8x128xi32>
    %c0_i32_25 = arith.constant 0 : i32
    %79 = vector.broadcast %c0_i32_25 : i32 to vector<8x128xi32>
    %80 = arith.cmpi eq, %77, %79 : vector<8x128xi32>
    %c0_i32_26 = arith.constant 0 : i32
    %81 = vector.broadcast %c0_i32_26 : i32 to vector<8x128xi32>
    %82 = arith.cmpi eq, %78, %81 : vector<8x128xi32>
    %83 = arith.andi %80, %82 : vector<8x128xi1>
    %c1_i32 = arith.constant 1 : i32
    %84 = vector.broadcast %c1_i32 : i32 to vector<8x128xi32>
    %85 = arith.cmpi eq, %78, %84 : vector<8x128xi32>
    %86 = arith.andi %80, %85 : vector<8x128xi1>
    %c2_i32_27 = arith.constant 2 : i32
    %87 = vector.broadcast %c2_i32_27 : i32 to vector<8x128xi32>
    %88 = arith.cmpi eq, %78, %87 : vector<8x128xi32>
    %89 = arith.andi %80, %88 : vector<8x128xi1>
    %c3_i32 = arith.constant 3 : i32
    %90 = vector.broadcast %c3_i32 : i32 to vector<8x128xi32>
    %91 = arith.cmpi eq, %78, %90 : vector<8x128xi32>
    %92 = arith.andi %80, %91 : vector<8x128xi1>
    %cst_28 = arith.constant 0.000000e+00 : f32
    %93 = vector.broadcast %65 : f32 to vector<8x128xf32>
    %94 = vector.broadcast %cst_28 : f32 to vector<8x128xf32>
    %95 = arith.select %92, %93, %94 : vector<8x128xi1>, vector<8x128xf32>
    %96 = vector.broadcast %61 : f32 to vector<8x128xf32>
    %97 = arith.select %89, %96, %95 : vector<8x128xi1>, vector<8x128xf32>
    %98 = vector.broadcast %57 : f32 to vector<8x128xf32>
    %99 = arith.select %86, %98, %97 : vector<8x128xi1>, vector<8x128xf32>
    %100 = vector.broadcast %76 : f32 to vector<8x128xf32>
    %101 = arith.select %83, %100, %99 : vector<8x128xi1>, vector<8x128xf32>
    %c0_29 = arith.constant 0 : index
    %c0_30 = arith.constant 0 : index
    %102 = vector.load %arg5[%c0_29, %c0_30] : memref<8x128xf32, #tpu.memory_space<vmem>>, vector<8x128xf32>
    %103 = arith.addf %102, %101 : vector<8x128xf32>
    %c0_31 = arith.constant 0 : index
    %c0_32 = arith.constant 0 : index
    %104 = vector.load %arg5[%c0_31, %c0_32] : memref<8x128xf32, #tpu.memory_space<vmem>>, vector<8x128xf32>
    tpu.vector_store %arg5[%c0_31, %c0_32], %103 {strides = array<i32>} : memref<8x128xf32, #tpu.memory_space<vmem>>, vector<8x128xf32>,
    return
  }
  func.func @transform_0(%arg0: i32, %arg1: i32) -> (i32, i32) {
    %c2_i32 = arith.constant 2 : i32
    %0 = arith.muli %arg0, %c2_i32 : i32
    %1 = arith.addi %0, %arg1 : i32
    %c0_i32 = arith.constant 0 : i32
    %c0_i32_0 = arith.constant 0 : i32
    return %1, %c0_i32 : i32, i32
  }
  func.func @transform_1(%arg0: i32, %arg1: i32) -> (i32, i32) {
    %c2_i32 = arith.constant 2 : i32
    %0 = arith.muli %arg0, %c2_i32 : i32
    %1 = arith.addi %0, %arg1 : i32
    %c0_i32 = arith.constant 0 : i32
    %c0_i32_0 = arith.constant 0 : i32
    return %1, %c0_i32 : i32, i32
  }
  func.func @transform_2(%arg0: i32, %arg1: i32) -> (i32, i32) {
    %c0_i32 = arith.constant 0 : i32
    %c0_i32_0 = arith.constant 0 : i32
    %c0_i32_1 = arith.constant 0 : i32
    return %c0_i32, %c0_i32_0 : i32, i32
  }
  func.func @transform_3(%arg0: i32, %arg1: i32) -> (i32, i32) {
    %c0_i32 = arith.constant 0 : i32
    %c0_i32_0 = arith.constant 0 : i32
    return %arg0, %c0_i32 : i32, i32
  }
}

</mosaic_0001>

<bundles_post_ra>
// kernel: tpu_custom_call.1
= control target key start
LH: loop header
LB: loop body
LE: loop exit
PB: predicated region body
PF: predicated region fallthrough
CT: control target
= control target key end

     0   :  { %8 = vsyncpa [#allocation3], 0  ;;  %s880_s0 = inlined_call_operand.vmem [shape: f32[32,5], index: 0, kind: input, shape index: {}]   ;;  %s881_s1 = inlined_call_operand.vmem [shape: s32[32,1], index: 1, kind: input, shape index: {}]   ;;  %s882_s2 = inlined_call_operand.vmem [shape: f32[1,128], index: 2, kind: input, shape index: {}]   ;;  %s883_s3 = inlined_call_operand.hbm [shape: f32[16,128], index: 3, kind: output, shape index: {}]  }
   0x1   :  { %10 = vsyncpa [#allocation3 + $0x1], 0  ;;  %s686_s12 = smov 0   ;;  %s688_s13 = smov 0  }
   0x2   :  { %s690_s14 = smov 0   ;;  %s692_s15 = smov 0  }
   0x3   :  { %s694_s16 = smov 0   ;;  %s696_s17 = smov 0  }
   0x4   :  { %s698_s18 = smov 0   ;;  %s700_s19 = smov 0  }
   0x5 LB: > { %s454_s20 = sadd.s32 4294967295, %s659_s19   ;;  %s455_s21 = sadd.s32 4294967294, %s659_s19   ;;  %s659_s19 = sphi %s700_s19, %s16_s19   ;;  %s655_s18 = sphi %s698_s18, %s893_s18   ;;  %s651_s17 = sphi %s696_s17, %s892_s17   ;;  %s647_s16 = sphi %s694_s16, %s891_s16   ;;  %s643_s15 = sphi %s692_s15, %s890_s15   ;;  %s639_s14 = sphi %s690_s14, %s889_s14   ;;  %s635_s13 = sphi %s688_s13, %s888_s13   ;;  %s631_s12 = sphi %s686_s12, %s887_s12  }
   0x6   : > { %s25_s22 = sadd.s32 1, %s651_s17  ;;  %s28_s23 = sadd.s32 1, %s655_s18 }
   0x7   : > { %p26_p0 = scmp.ge.s32.totalorder %s25_s22, 2  ;;  %p126_p1 = scmp.ne.s32.totalorder %s639_s14, %s635_s13 }
   0x8   : > { %p127_p2 = scmp.eq.s32.totalorder %s454_s20, 3  ;;  %p132_p4 = scmp.ne.s32.totalorder %s635_s13, %s631_s12 }
   0x9   : > { %s895_s22 = smov (%p26_p0, %s25_s22), 0  ;;  %s897_s23 = smov (!%p26_p0, %s28_s23), %s655_s18 }
   0xa   : > { %p735_p3 = por %p127_p2, %p126_p1  ;;  %p30_p5 = scmp.ge.s32.totalorder %s897_s23, 2 }
   0xb   : > { %p133_p6 = scmp.eq.s32.totalorder %s455_s21, 3  ;;  %p462_p7 = scmp.ge.s32.totalorder %s659_s19, 1 }
   0xc   : > { %p176_p8 = scmp.lt.s32.totalorder %s659_s19, 5  ;;  %s899_s23 = smov (%p30_p5, %s897_s23), 0 }
   0xd   : > { %p745_p9 = por %p133_p6, %p132_p4  ;;  %s113_s26 = ssub.s32 %s655_s18, %s899_s23 }
   0xe   : > { %p177_p10 = pnand %p462_p7, %p176_p8  ;;  %s116_s27 = sadd.s32 1, %s639_s14 }
   0xf   : > { %p114_p11 = scmp.eq.s32.totalorder %s113_s26, 0  ;;  %s204_s29 = sand.u32 (!%p177_p10), 1, %s635_s13  }
  0x10   : > { %180 = sbr.rel (%p177_p10) target bundleno = 710 (0x2c6), region = 32  ;;  %s464_s30 = sshll.u32 (!%p177_p10), %s647_s16, 1 }
  0x11   : > { %s753_s28 = scalar_select %p114_p11, %s639_s14, %s116_s27  }
  0x12   : > { %s463_s4 = sshll.u32 (!%p177_p10), %s204_s29, 3  ;;  %s760_s5 = sadd.s32 (!%p177_p10), %s643_s15, %s464_s30 }
  0x13   : > { %p209_p12 = scmp.lt.s32.totalorder (!%p177_p10), %s760_s5, 3  ;;  %p223_p13 = scmp.eq.s32.totalorder (!%p177_p10), %s643_s15, 0 }
  0x14   : > { %s771_s26 = scalar_lea.vmem (!%p177_p10), [#allocation2], %s463_s4  ;;  %p468_p0 = scmp.ne.s32.totalorder (!%p177_p10), %s643_s15, 0 }
  0x17   : > { %s210_s6 = scalar_select %p209_p12, %s760_s5, 3 }
  0x18   : > { %226 = sbr.rel (%p468_p0) target bundleno = 31 (0x1f), region = 36  ;;  %v661_v0 = vmov (!%p468_p0), 0.0  }
  0x19   : > { %s465_s7 = sshll.u32 %s210_s6, 3  ;;  %227 = vst [vmem:[%s771_s26] sm:$0xff] (!%p468_p0), %v661_v0 }
  0x1a   : > { %s212_s10 = scalar_lea.vmem %s880_s0, %s465_s7  ;;  %s220_s21 = scalar_lea.vmem %s881_s1, %s465_s7 }
  0x1f PF: > { %v228_v1 = vld [vmem:[%s212_s10] sm:$0xff]  ;;  %vm238_vm0 = vcmask 39936   ;;  %v662_v4 = vmov 0   ;;  %v233_v5 = vlaneseq  ;;  %s470_s27 = sshll.u32 %s760_s5, 3  ;;  %v663_v26 = vmov 1.0   ;;  %p320_p1 = scmp.eq.s32.totalorder %s647_s16, 0 }
  0x20   : > { %v229_v2 = vld [vmem:[%s220_s21] sm:$0xff]  ;;  %v239_v3 = vsel %vm238_vm0, %v228_v1, -inf  ;;  %559 = vset.pattern.permute.xlu1 %v662_v4  ;;  %560 = vset.pattern.permute.xlu0 %v662_v4  ;;  %v235_v24 = vstv %s470_s27  ;;  %vm289_vm6 = vcmask 7168   ;;  %v664_v45 = vmov 0.0   ;;  %s473_s11 = sshll.u32 %s647_s16, 7  ;;  %s372_s20 = sshll.u32 %s771_s26, 4  ;;  %s826_s20 = int_to_ptr.vmem [resolvable:$true] %s372_s20 }
  0x21   : > { %240 = vmax.xlane.f32.xlu0 %v239_v3  ;;  %254 = vperm.xlu1 %559, %v229_v2   ;;  %v776_v6 = vand.u32 127, %v233_v5  ;;  %v784_v23 = vshrl.u32 %v233_v5, 7  ;;  %vm262_vm4 = vcmp.eq.s32.totalorder %v229_v2, 4  ;;  %vm284_vm7 = vcmp.ne.s32.totalorder %v229_v2, 4  ;;  %v323_v43 = vld [vmem:[%s882_s2] sm:$0x1]  ;;  %p801_p2 = pnand %p320_p1, %p223_p13  ;;  %s824_s30 = scalar_lea.hbm %s883_s3, %s473_s11 }
  0x22   : > { %v263_v27 = vsel %vm262_vm4, 0.1, %v663_v26  ;;  %v324_v47 = vand.u32 2147483647, %v323_v43  ;;  %vm325_vm11 = vcmask 1040384   ;;  %s359_s4 = scalar_lea.sflag [#allocation3], %s204_s29 }
  0x23   : > { %v236_v25 = vadd.s32 %v235_v24, %v784_v23  ;;  %vm338_vm12 = vcmp.eq.s32.totalorder %v784_v23, 0  ;;  %vm345_vm13 = vcmp.eq.s32.totalorder %v776_v6, 3  ;;  %vm343_vm14 = vcmp.eq.s32.totalorder %v776_v6, 2  ;;  %s471_s15 = scalar_select %p801_p2, 0.0, 1.0 }
  0x24   : > { %v326_v49 = vsel %vm325_vm11, %v324_v47, 0.0  ;;  %vm346_vm15 = vmand %vm338_vm12, %vm345_vm13  ;;  %s665_s16 = smov [#allocation2]  }
  0x25   : > { %vm237_vm5 = vcmp.lt.s32.totalorder %v236_v25, 32  ;;  %s569_s6 = sshll.u32 %s665_s16, 4  ;;  %s570_s6 = int_to_ptr.vmem [resolvable:$false] %s569_s6 }
  0x26   : > { %v264_v28 = vsel %vm237_vm5, %v263_v27, 0.0  ;;  %vm285_vm8 = vmand %vm237_vm5, %vm284_vm7  ;;  %p572_p7 = scmp.lt.s32.totalorder %s826_s20, %s570_s6 }
  0x27   : > { %v300_v29 = vsel %vm289_vm6, %v264_v28, 0.0 }
  0xa0   : > { %v255_v16 = vpop.permute.xlu1 %254 }
  0xa1   : > { %vm256_vm2 = vcmp.eq.s32.totalorder %v776_v6, %v255_v16 }
  0xa2   : > { %v257_v20 = vsel %vm256_vm2, %v228_v1, 0.0  ;;  %vm339_vm2 = vcmp.eq.s32.totalorder %v776_v6, 0 }
  0xa3   : > { %v258_v22 = vsel %vm238_vm0, %v257_v20, 0.0  ;;  %vm340_vm4 = vmand %vm338_vm12, %vm339_vm2  ;;  %v355_v20 = vld [vmem:[%s771_s26] sm:$0xff] }
  0xae   : > { %v241_v7 = vpop.xlane.xlu0 %240 }
  0xaf   : > { %v242_v8 = vsub.f32 %v228_v1, %v241_v7  ;;  %vm267_vm1 = vcmp.eq.f32.partialorder %v228_v1, %v241_v7 }
  0xb0   : > { %v268_v9 = vsel %vm267_vm1, %v776_v6, 5  ;;  %vm341_vm1 = vcmp.eq.s32.totalorder %v776_v6, 1 }
  0xb1   : > { %v243_v10 = vmul.f32 1.442695, %v242_v8  ;;  %v269_v11 = vsel %vm238_vm0, %v268_v9, 2147483647 }
  0xb2   : > { %v271_v12 = vshra.s32 %v269_v11, 16  ;;  %v270_v17 = vand.u32 65535, %v269_v11 }
  0xb3   : > { %561 = vpow2.f32 %v243_v10 }
  0xb4   : > { %v273_v13 = vcvt.s32.f32 %v271_v12  ;;  %v272_v19 = vcvt.s32.f32 %v270_v17 }
  0xb6   : > { %274 = vmin.xlane.f32.xlu0 %v273_v13 }
  0xbd   : > { %v562_v14 = vpop.eup %561 }
  0xbe   : > { %v245_v15 = vsel %vm238_vm0, %v562_v14, 0.0  ;;  %vm344_vm0 = vmand %vm338_vm12, %vm343_vm14 }
  0xbf   : > { %246 = vadd.xlane.f32.xlu1 %v245_v15 }
 0x143   : > { %v275_v18 = vpop.xlane.xlu0 %274 }
 0x144   : > { %vm276_vm3 = vcmp.eq.f32.partialorder %v273_v13, %v275_v18  ;;  %v281_v32 = vcvt.f32.s32 %v275_v18 }
 0x145   : > { %v277_v21 = vsel %vm276_vm3, %v272_v19, inf  ;;  %vm342_vm3 = vmand %vm338_vm12, %vm341_vm1 }
 0x146   : > { %278 = vmin.xlane.f32.xlu0 %v277_v21  ;;  %v282_v35 = vshll.u32 %v281_v32, 16 }
 0x14a   : > { %259 = vadd.xlane.f32.xlu0 %v258_v22 }
 0x14c   : > { %v247_v30 = vpop.xlane.xlu1 %246 }
 0x14d   : > { %563 = vlog2.f32 %v247_v30 }
 0x14e   : > { %301 = vadd.xlane.f32.xlu0 %v300_v29 }
 0x157   : > { %v564_v31 = vpop.eup %563 }
 0x158   : > { %v249_v33 = vmul.f32 0.6931472, %v564_v31 }
 0x15a   : > { %v250_v38 = vadd.f32 %v249_v33, %v241_v7 }
 0x1d3   : > { %v279_v34 = vpop.xlane.xlu0 %278 }
 0x1d4   : > { %v280_v36 = vcvt.f32.s32 %v279_v34 }
 0x1d6   : > { %v283_v37 = vadd.s32 %v282_v35, %v280_v36 }
 0x1d7   : > { %v260_v39 = vpop.xlane.xlu0 %259 }
 0x1d8   : > { %v261_v40 = vsub.f32 %v250_v38, %v260_v39  ;;  %vm286_vm9 = vcmp.eq.s32.totalorder %v283_v37, %v229_v2 }
 0x1d9   : > { %vm287_vm10 = vmand %vm285_vm8, %vm286_vm9 }
 0x1da   : > { %v265_v41 = vmul.f32 %v263_v27, %v261_v40  ;;  %v288_v46 = vsel %vm287_vm10, 1.0, %v664_v45 }
 0x1db   : > { %v310_v48 = vsel %vm289_vm6, %v288_v46, 0.0  ;;  %v302_v50 = vpop.xlane.xlu0 %301 }
 0x1dc   : > { %v266_v42 = vsel %vm237_vm5, %v265_v41, 0.0  ;;  %v303_v51 = vrot.slane %v302_v50, 4 }
 0x1dd   : > { %v290_v44 = vsel %vm289_vm6, %v266_v42, 0.0 }
 0x1de   : > { %291 = vadd.xlane.f32.xlu0 %v290_v44  ;;  %v304_v52 = vadd.f32 %v303_v51, %v302_v50 }
 0x1e0   : > { %v305_v53 = vrot.slane %v304_v52, 2 }
 0x1e2   : > { %311 = vadd.xlane.f32.xlu0 %v310_v48  ;;  %v306_v58 = vadd.f32 %v305_v53, %v304_v52 }
 0x1e4   : > { %v307_v0 = vrot.slane %v306_v58, 1 }
 0x1e6   : > { %327 = vadd.xlane.f32.xlu0 %v326_v49  ;;  %v308_v8 = vadd.f32 %v307_v0, %v306_v58 }
 0x26b   : > { %v292_v54 = vpop.xlane.xlu0 %291 }
 0x26c   : > { %v293_v55 = vrot.slane %v292_v54, 4 }
 0x26e   : > { %v294_v56 = vadd.f32 %v293_v55, %v292_v54 }
 0x26f   : > { %v312_v57 = vpop.xlane.xlu0 %311 }
 0x270   : > { %v295_v59 = vrot.slane %v294_v56, 2  ;;  %v313_v60 = vrot.slane %v312_v57, 4 }
 0x272   : > { %v314_v61 = vadd.f32 %v313_v60, %v312_v57  ;;  %v296_v62 = vadd.f32 %v295_v59, %v294_v56 }
 0x273   : > { %v328_v63 = vpop.xlane.xlu0 %327 }
 0x274   : > { %v315_v1 = vrot.slane %v314_v61, 2  ;;  %v329_v2 = vrot.slane %v328_v63, 4  ;;  %v297_v3 = vrot.slane %v296_v62, 1 }
 0x276   : > { %v330_v4 = vadd.f32 %v329_v2, %v328_v63  ;;  %v298_v5 = vadd.f32 %v297_v3, %v296_v62  ;;  %v316_v7 = vadd.f32 %v315_v1, %v314_v61 }
 0x278   : > { %v331_v9 = vrot.slane %v330_v4, 2  ;;  %476 = vpush %v298_v5  ;;  %v317_v10 = vrot.slane %v316_v7, 1 }
 0x279   : > { %478 = vpush %v308_v8 }
 0x27a   : > { %v332_v11 = vadd.f32 %v331_v9, %v330_v4  ;;  %v318_v12 = vadd.f32 %v317_v10, %v316_v7 }
 0x27c   : > { %480 = vpush %v318_v12  ;;  %v333_v13 = vrot.slane %v332_v11, 1 }
 0x27e   : > { %v334_v14 = vadd.f32 %v333_v13, %v332_v11 }
 0x280   : > { %482 = vpush %v334_v14 }
 0x2a9   : > { %s477_s5 = spop %476 }
 0x2aa   : > { %s479_s7 = spop %478  ;;  %v351_v19 = vstv %s477_s5  ;;  %s565_s5 = scalar_lea.vmem %s826_s20, 128 }
 0x2ab   : > { %v349_v17 = vstv %s479_s7  ;;  %p566_p4 = scmp.ne.s32.totalorder %s826_s20, %s565_s5  ;;  %s571_s7 = scalar_lea.vmem %s570_s6, 256 }
 0x2ac   : > { %p573_p8 = scmp.lt.s32.totalorder %s571_s7, %s565_s5 }
 0x2ad   : > { %s481_s8 = spop %480  ;;  %p567_p5 = pnand %p566_p4, %p735_p3 }
 0x2ae   : > { %v347_v15 = vstv %s481_s8  ;;  %p574_p10 = por %p573_p8, %p572_p7 }
 0x2af   : > { %v348_v16 = vsel %vm346_vm15, %v347_v15, 0.0  ;;  %p568_p6 = pneg %p567_p5 }
 0x2b0   : > { %v350_v18 = vsel %vm344_vm0, %v349_v17, %v348_v16 }
 0x2b1   : > { %s483_s9 = spop %482  ;;  %v352_v21 = vsel %vm342_vm3, %v351_v19, %v350_v18  ;;  %p575_p11 = pnand %p574_p10, %p568_p6 }
 0x2b2   : > { %s337_s10 = smul.f32 %s483_s9, %s471_s15 }
 0x2b4   : > { %v353_v22 = vstv %s337_s10 }
 0x2b5   : > { %v354_v6 = vsel %vm340_vm4, %v353_v22, %v352_v21 }
 0x2b6   : > { %v356_v24 = vadd.f32 %v355_v20, %v354_v6 }
 0x2b8   : > { %357 = vst [vmem:[%s771_s26] sm:$0xff] %v356_v24 }
 0x2b9   : > { %578 = shalt.err (!%p575_p11)
}
 0x2ba   : > { %s579_s29 = scalar_lea.hbm %s824_s30, 128  ;;  %s583_s15 = scalar_lea.hbm %s883_s3, 256 }
 0x2bb   : > { %p580_p12 = scmp.ne.s32.totalorder %s824_s30, %s579_s29  ;;  %p584_p1 = scmp.lt.u32.totalorder %s824_s30, %s883_s3 }
 0x2bc   : > { %p585_p2 = scmp.lt.u32.totalorder %s583_s15, %s579_s29  ;;  %p587_p5 = scmp.lt.u32.totalorder %s579_s29, %s824_s30 }
 0x2bd   : > { %p581_p13 = pnand %p580_p12, %p735_p3 }
 0x2be   : > { %p586_p4 = por %p585_p2, %p584_p1 }
 0x2bf   : > { %p582_p0 = pneg %p581_p13 }
 0x2c0   : > { %p588_p6 = por %p587_p5, %p586_p4 }
 0x2c2   : > { %p589_p7 = pnand %p588_p6, %p582_p0 }
 0x2c4   : > { %592 = shalt.err (!%p589_p7)
}
 0x2c5   : > { %484 = dma.vmem_to_hbm [thread:$0]  (%p735_p3), %s826_s20, 128, %s824_s30, %s359_s4  }
 0x2c6 PF: > { %p490_p8 = scmp.ge.s32.totalorder %s659_s19, 2  ;;  %s384_s11 = sand.u32 1, %s631_s12  }
 0x2c7   : > { %s385_s21 = scalar_lea.sflag [#allocation3], %s384_s11 }
 0x2c8   : > { %p487_p10 = pnand %p490_p8, %p745_p9 }
 0x2ca   : > { %626 = dma.done.wait (!%p487_p10), %s385_s21, 128  }
 0x2cb   : > { %628 = vsyncadd (!%p487_p10), %s385_s21, 4294967168  ;;  %s16_s19 = sadd.s32 1, %s659_s19   ;;  %s887_s12 = smov %s635_s13 }
 0x2cc   : > { %p13_p11 = scmp.ge.s32.totalorder %s16_s19, 6   ;;  %s888_s13 = smov %s639_s14 }
 0x2cd   : > { %s889_s14 = smov %s753_s28  ;;  %s890_s15 = smov %s651_s17 }
 0x2ce   : > { %s891_s16 = smov %s655_s18  ;;  %s892_s17 = smov %s895_s22 }
 0x2cf   : > { %s893_s18 = smov %s899_s23  ;;  %15 = sbr.rel (!%p13_p11) target bundleno = 5 (0x5), region = 74 }
 0x2d6   :  { %390 = vsyncpa [#allocation3], 1 }
 0x2d7   :  { %392 = vsyncpa [#allocation3 + $0x1], 1 }

</bundles_post_ra>
